<compile_context>
chip_gen: v7x
topology: tpu7x:2x2x1
jax: 0.10.0
libtpu: 0.0.40
codegen_flags: <defaults>
</compile_context>

<pallas_src>
import functools

import jax
import jax.numpy as jnp
from jax import lax
from jax.experimental import pallas as pl
from jax.experimental.pallas import tpu as pltpu


# ----------------------------------------------------------------------------
# Pallas kernel: tap-accumulated conv + folded-BN shift + ReLU, one image/step
# ----------------------------------------------------------------------------
def _conv_bn_relu_kernel(x_ref, w_ref, shift_ref, o_ref, *,
                         tap_offsets, wide, apply_relu):
    # x_ref:     (1, C_in, L)          zero-padded image, (H_p, W_p) flattened
    # w_ref:     (kh*kw, C_out, C_in)  conv weight with BN scale folded in
    # shift_ref: (C_out, 1)            folded BN shift (+ conv bias)
    # o_ref:     (1, C_out, wide)      dense output, wide = H_dense * W_p
    x = x_ref[0]                                     # (C_in, L)
    c_out = w_ref.shape[1]
    acc = jnp.zeros((c_out, wide), dtype=jnp.float32)
    for t, off in enumerate(tap_offsets):            # static unroll over taps
        win = x[:, off:off + wide]                   # (C_in, wide) lane slice
        acc = acc + jnp.dot(w_ref[t], win,
                            preferred_element_type=jnp.float32)
    y = acc + shift_ref[...]
    if apply_relu:
        y = jnp.maximum(y, 0.0)
    o_ref[0] = y.astype(o_ref.dtype)


def _fused_conv_bn_relu(x_flat, w_taps, shift, *, wide, tap_offsets,
                        apply_relu):
    N, C_in, L = x_flat.shape
    n_taps, C_out, _ = w_taps.shape
    kernel = functools.partial(_conv_bn_relu_kernel,
                               tap_offsets=tap_offsets, wide=wide,
                               apply_relu=apply_relu)
    return pl.pallas_call(
        kernel,
        out_shape=jax.ShapeDtypeStruct((N, C_out, wide), jnp.float32),
        grid=(N,),
        in_specs=[
            pl.BlockSpec((1, C_in, L), lambda n: (n, 0, 0)),
            pl.BlockSpec((n_taps, C_out, C_in), lambda n: (0, 0, 0)),
            pl.BlockSpec((C_out, 1), lambda n: (0, 0)),
        ],
        out_specs=pl.BlockSpec((1, C_out, wide), lambda n: (n, 0, 0)),
        compiler_params=pltpu.CompilerParams(
            dimension_semantics=("parallel",)),
    )(x_flat, w_taps, shift)


# ----------------------------------------------------------------------------
# Forward: pad once, flatten spatial, run kernel, crop padded columns
# ----------------------------------------------------------------------------
@functools.partial(jax.jit, static_argnames=(
    "kh", "kw", "stride", "padding", "dilation", "apply_relu"))
def _basic_conv_forward(x, w_taps, shift, *, kh, kw, stride, padding,
                        dilation, apply_relu):
    N, C_in, H, W = x.shape
    H_pb = H + 2 * padding
    W_p = W + 2 * padding
    H_dense = H_pb - dilation * (kh - 1)             # stride-1 output rows
    W_dense = W_p - dilation * (kw - 1)              # stride-1 output cols
    H_out = (H_dense - 1) // stride + 1
    W_out = (W_dense - 1) // stride + 1
    wide = H_dense * W_p

    # A few extra zero rows at the bottom keep every tap's lane slice in
    # bounds of the flattened spatial axis.
    extra_rows = -(-(dilation * (kw - 1)) // W_p)
    x_pad = jnp.pad(x, ((0, 0), (0, 0),
                        (padding, padding + extra_rows),
                        (padding, padding)))
    x_flat = x_pad.reshape(N, C_in, (H_pb + extra_rows) * W_p)

    tap_offsets = tuple(dilation * (i * W_p + j)
                        for i in range(kh) for j in range(kw))

    out_wide = _fused_conv_bn_relu(x_flat, w_taps, shift, wide=wide,
                                   tap_offsets=tap_offsets,
                                   apply_relu=apply_relu)
    # Output is already NCHW-ordered; just drop the W-padding columns and
    # (for stride > 1) subsample the dense stride-1 result.
    # TODO(synk): stride > 1 computes densely then subsamples (correct but
    #             wasteful for large strides).
    out = out_wide.reshape(N, -1, H_dense, W_p)
    return out[:, :,
               0:(H_out - 1) * stride + 1:stride,
               0:(W_out - 1) * stride + 1:stride]


class BasicConvPallas:
    """Mirrors BasicConv(in_planes, out_planes, kernel_size, ...) forward."""

    def __init__(self, in_planes, out_planes, kernel_size, stride=1,
                 padding=0, dilation=1, groups=1, relu=True, bn=True,
                 bias=False, *, key):
        assert groups == 1, "groups > 1 not implemented"
        self.in_planes = in_planes
        self.out_planes = out_planes
        self.kh = self.kw = kernel_size
        self.stride = stride
        self.padding = padding
        self.dilation = dilation
        self.apply_relu = bool(relu)
        self.use_bn = bool(bn)
        self.use_bias = bool(bias)
        self.eps = 1e-5

        k_w, k_g, k_b, k_m, k_v, k_bi = jax.random.split(key, 6)
        fan_in = in_planes * kernel_size * kernel_size
        bound = 1.0 / (fan_in ** 0.5)
        # Conv weight: (C_out, C_in, kh, kw), PyTorch default-ish init.
        self.weight = jax.random.uniform(
            k_w, (out_planes, in_planes, kernel_size, kernel_size),
            minval=-bound, maxval=bound, dtype=jnp.float32)
        self.bias = (jax.random.uniform(k_bi, (out_planes,), minval=-bound,
                                        maxval=bound, dtype=jnp.float32)
                     if bias else None)
        if bn:
            self.gamma = 1.0 + 0.1 * jax.random.normal(k_g, (out_planes,),
                                                       jnp.float32)
            self.beta = 0.1 * jax.random.normal(k_b, (out_planes,),
                                                jnp.float32)
            self.running_mean = 0.05 * jax.random.normal(k_m, (out_planes,),
                                                         jnp.float32)
            self.running_var = jnp.abs(
                1.0 + 0.1 * jax.random.normal(k_v, (out_planes,),
                                              jnp.float32))
        else:
            self.gamma = self.beta = None
            self.running_mean = self.running_var = None

        # One-time fold of inference-mode BN (+ optional conv bias) into the
        # matmul weight and a per-channel shift (reused every forward call).
        if bn:
            scale = self.gamma / jnp.sqrt(self.running_var + self.eps)
            shift = self.beta - self.running_mean * scale
        else:
            scale = jnp.ones((out_planes,), jnp.float32)
            shift = jnp.zeros((out_planes,), jnp.float32)
        if bias:
            shift = shift + scale * self.bias
        w_folded = self.weight * scale[:, None, None, None]
        # (C_out, C_in, kh, kw) -> (kh*kw, C_out, C_in), matching tap order.
        self.w_taps = jnp.transpose(w_folded, (2, 3, 0, 1)).reshape(
            kernel_size * kernel_size, out_planes, in_planes)
        self.shift = shift.reshape(out_planes, 1)

    def __call__(self, x):
        # x: (N, C_in, H, W) float32 -> (N, C_out, H_out, W_out) float32
        return _basic_conv_forward(
            x, self.w_taps, self.shift,
            kh=self.kh, kw=self.kw, stride=self.stride,
            padding=self.padding, dilation=self.dilation,
            apply_relu=self.apply_relu)


# ----------------------------------------------------------------------------
# Pure-JAX reference for verification
# ----------------------------------------------------------------------------
def _reference(module, x):
    y = lax.conv_general_dilated(
        x, module.weight,
        window_strides=(module.stride, module.stride),
        padding=[(module.padding, module.padding)] * 2,
        rhs_dilation=(module.dilation, module.dilation),
        dimension_numbers=("NCHW", "OIHW", "NCHW"))
    if module.use_bias:
        y = y + module.bias[None, :, None, None]
    if module.use_bn:
        scale = module.gamma / jnp.sqrt(module.running_var + module.eps)
        shift = module.beta - module.running_mean * scale
        y = y * scale[None, :, None, None] + shift[None, :, None, None]
    if module.apply_relu:
        y = jnp.maximum(y, 0.0)
    return y


if __name__ == "__main__":
    key = jax.random.PRNGKey(0)
    k_x, k_p = jax.random.split(key)

    # Small shapes: batch=2, in_channels=4, out_channels=8, spatial=16,
    # kernel_size=3, stride=1, padding=1 ("same"-style conv).
    N, C_in, H, W = 2, 4, 16, 16
    C_out, ksize = 8, 3

    module = BasicConvPallas(C_in, C_out, ksize, stride=1, padding=1,
                             relu=True, bn=True, bias=False, key=k_p)
    x = jax.random.normal(k_x, (N, C_in, H, W), dtype=jnp.float32)

    out = jax.block_until_ready(module(x))
    ref = jax.block_until_ready(_reference(module, x))

    assert out.shape == (N, C_out, H, W), out.shape
    max_err = float(jnp.max(jnp.abs(out - ref)))
    assert jnp.allclose(out, ref, atol=2e-4, rtol=2e-4), max_err
    print("KERNEL_OK")
</pallas_src>

<mosaic_0001>
module attributes {stable_mosaic.version = 11 : i64} {
  func.func @_conv_bn_relu_kernel(%arg0: i32, %arg1: memref<1x4x342xf32, #tpu.memory_space<vmem>>, %arg2: memref<9x8x4xf32, #tpu.memory_space<vmem>>, %arg3: memref<8x1xf32, #tpu.memory_space<vmem>>, %arg4: memref<1x8x288xf32, #tpu.memory_space<vmem>>) attributes {dimension_semantics = [#tpu.dimension_semantics<parallel>], iteration_bounds = array<i64: 2>, scalar_prefetch = 0 : i64, scratch_operands = 0 : i64, tpu.core_type = #tpu.core_type<tc>, window_params = [{transform_indices = @transform_0, window_bounds = array<i64: 1, 4, 342>}, {pipeline_mode = #tpu.pipeline_mode<synchronous>, transform_indices = @transform_1, window_bounds = array<i64: 9, 8, 4>}, {pipeline_mode = #tpu.pipeline_mode<synchronous>, transform_indices = @transform_2, window_bounds = array<i64: 8, 1>}, {transform_indices = @transform_3, window_bounds = array<i64: 1, 8, 288>}]} {
    %c0 = arith.constant 0 : index
    %c0_0 = arith.constant 0 : index
    %c0_1 = arith.constant 0 : index
    %0 = vector.load %arg1[%c0, %c0_0, %c0_1] : memref<1x4x342xf32, #tpu.memory_space<vmem>>, vector<1x4x342xf32>
    %1 = vector.shape_cast %0 : vector<1x4x342xf32> to vector<4x342xf32>
    %cst = arith.constant 0.000000e+00 : f32
    %2 = vector.broadcast %cst : f32 to vector<8x288xf32>
    %3 = vector.extract_strided_slice %1 {offsets = [0, 0], sizes = [4, 288], strides = [1, 1]} : vector<4x342xf32> to vector<4x288xf32>
    %c0_2 = arith.constant 0 : index
    %c0_3 = arith.constant 0 : index
    %c0_4 = arith.constant 0 : index
    %4 = vector.load %arg2[%c0_2, %c0_3, %c0_4] : memref<9x8x4xf32, #tpu.memory_space<vmem>>, vector<1x8x4xf32>
    %5 = vector.shape_cast %4 : vector<1x8x4xf32> to vector<8x4xf32>
    %cst_5 = arith.constant dense<0.000000e+00> : vector<8x288xf32>
    %6 = tpu.matmul %5, %3, %cst_5 {dimension_numbers = #tpu.dot_dimension_numbers<[1], [0], [0], [1], [0, 0, 1, 1], [], []>} : vector<8x4xf32>, vector<4x288xf32>, vector<8x288xf32> -> vector<8x288xf32>
    %7 = arith.addf %2, %6 : vector<8x288xf32>
    %8 = vector.extract_strided_slice %1 {offsets = [0, 1], sizes = [4, 288], strides = [1, 1]} : vector<4x342xf32> to vector<4x288xf32>
    %c1 = arith.constant 1 : index
    %c0_6 = arith.constant 0 : index
    %c0_7 = arith.constant 0 : index
    %9 = vector.load %arg2[%c1, %c0_6, %c0_7] : memref<9x8x4xf32, #tpu.memory_space<vmem>>, vector<1x8x4xf32>
    %10 = vector.shape_cast %9 : vector<1x8x4xf32> to vector<8x4xf32>
    %cst_8 = arith.constant dense<0.000000e+00> : vector<8x288xf32>
    %11 = tpu.matmul %10, %8, %cst_8 {dimension_numbers = #tpu.dot_dimension_numbers<[1], [0], [0], [1], [0, 0, 1, 1], [], []>} : vector<8x4xf32>, vector<4x288xf32>, vector<8x288xf32> -> vector<8x288xf32>
    %12 = arith.addf %7, %11 : vector<8x288xf32>
    %13 = vector.extract_strided_slice %1 {offsets = [0, 2], sizes = [4, 288], strides = [1, 1]} : vector<4x342xf32> to vector<4x288xf32>
    %c2 = arith.constant 2 : index
    %c0_9 = arith.constant 0 : index
    %c0_10 = arith.constant 0 : index
    %14 = vector.load %arg2[%c2, %c0_9, %c0_10] : memref<9x8x4xf32, #tpu.memory_space<vmem>>, vector<1x8x4xf32>
    %15 = vector.shape_cast %14 : vector<1x8x4xf32> to vector<8x4xf32>
    %cst_11 = arith.constant dense<0.000000e+00> : vector<8x288xf32>
    %16 = tpu.matmul %15, %13, %cst_11 {dimension_numbers = #tpu.dot_dimension_numbers<[1], [0], [0], [1], [0, 0, 1, 1], [], []>} : vector<8x4xf32>, vector<4x288xf32>, vector<8x288xf32> -> vector<8x288xf32>
    %17 = arith.addf %12, %16 : vector<8x288xf32>
    %18 = vector.extract_strided_slice %1 {offsets = [0, 18], sizes = [4, 288], strides = [1, 1]} : vector<4x342xf32> to vector<4x288xf32>
    %c3 = arith.constant 3 : index
    %c0_12 = arith.constant 0 : index
    %c0_13 = arith.constant 0 : index
    %19 = vector.load %arg2[%c3, %c0_12, %c0_13] : memref<9x8x4xf32, #tpu.memory_space<vmem>>, vector<1x8x4xf32>
    %20 = vector.shape_cast %19 : vector<1x8x4xf32> to vector<8x4xf32>
    %cst_14 = arith.constant dense<0.000000e+00> : vector<8x288xf32>
    %21 = tpu.matmul %20, %18, %cst_14 {dimension_numbers = #tpu.dot_dimension_numbers<[1], [0], [0], [1], [0, 0, 1, 1], [], []>} : vector<8x4xf32>, vector<4x288xf32>, vector<8x288xf32> -> vector<8x288xf32>
    %22 = arith.addf %17, %21 : vector<8x288xf32>
    %23 = vector.extract_strided_slice %1 {offsets = [0, 19], sizes = [4, 288], strides = [1, 1]} : vector<4x342xf32> to vector<4x288xf32>
    %c4 = arith.constant 4 : index
    %c0_15 = arith.constant 0 : index
    %c0_16 = arith.constant 0 : index
    %24 = vector.load %arg2[%c4, %c0_15, %c0_16] : memref<9x8x4xf32, #tpu.memory_space<vmem>>, vector<1x8x4xf32>
    %25 = vector.shape_cast %24 : vector<1x8x4xf32> to vector<8x4xf32>
    %cst_17 = arith.constant dense<0.000000e+00> : vector<8x288xf32>
    %26 = tpu.matmul %25, %23, %cst_17 {dimension_numbers = #tpu.dot_dimension_numbers<[1], [0], [0], [1], [0, 0, 1, 1], [], []>} : vector<8x4xf32>, vector<4x288xf32>, vector<8x288xf32> -> vector<8x288xf32>
    %27 = arith.addf %22, %26 : vector<8x288xf32>
    %28 = vector.extract_strided_slice %1 {offsets = [0, 20], sizes = [4, 288], strides = [1, 1]} : vector<4x342xf32> to vector<4x288xf32>
    %c5 = arith.constant 5 : index
    %c0_18 = arith.constant 0 : index
    %c0_19 = arith.constant 0 : index
    %29 = vector.load %arg2[%c5, %c0_18, %c0_19] : memref<9x8x4xf32, #tpu.memory_space<vmem>>, vector<1x8x4xf32>
    %30 = vector.shape_cast %29 : vector<1x8x4xf32> to vector<8x4xf32>
    %cst_20 = arith.constant dense<0.000000e+00> : vector<8x288xf32>
    %31 = tpu.matmul %30, %28, %cst_20 {dimension_numbers = #tpu.dot_dimension_numbers<[1], [0], [0], [1], [0, 0, 1, 1], [], []>} : vector<8x4xf32>, vector<4x288xf32>, vector<8x288xf32> -> vector<8x288xf32>
    %32 = arith.addf %27, %31 : vector<8x288xf32>
    %33 = vector.extract_strided_slice %1 {offsets = [0, 36], sizes = [4, 288], strides = [1, 1]} : vector<4x342xf32> to vector<4x288xf32>
    %c6 = arith.constant 6 : index
    %c0_21 = arith.constant 0 : index
    %c0_22 = arith.constant 0 : index
    %34 = vector.load %arg2[%c6, %c0_21, %c0_22] : memref<9x8x4xf32, #tpu.memory_space<vmem>>, vector<1x8x4xf32>
    %35 = vector.shape_cast %34 : vector<1x8x4xf32> to vector<8x4xf32>
    %cst_23 = arith.constant dense<0.000000e+00> : vector<8x288xf32>
    %36 = tpu.matmul %35, %33, %cst_23 {dimension_numbers = #tpu.dot_dimension_numbers<[1], [0], [0], [1], [0, 0, 1, 1], [], []>} : vector<8x4xf32>, vector<4x288xf32>, vector<8x288xf32> -> vector<8x288xf32>
    %37 = arith.addf %32, %36 : vector<8x288xf32>
    %38 = vector.extract_strided_slice %1 {offsets = [0, 37], sizes = [4, 288], strides = [1, 1]} : vector<4x342xf32> to vector<4x288xf32>
    %c7 = arith.constant 7 : index
    %c0_24 = arith.constant 0 : index
    %c0_25 = arith.constant 0 : index
    %39 = vector.load %arg2[%c7, %c0_24, %c0_25] : memref<9x8x4xf32, #tpu.memory_space<vmem>>, vector<1x8x4xf32>
    %40 = vector.shape_cast %39 : vector<1x8x4xf32> to vector<8x4xf32>
    %cst_26 = arith.constant dense<0.000000e+00> : vector<8x288xf32>
    %41 = tpu.matmul %40, %38, %cst_26 {dimension_numbers = #tpu.dot_dimension_numbers<[1], [0], [0], [1], [0, 0, 1, 1], [], []>} : vector<8x4xf32>, vector<4x288xf32>, vector<8x288xf32> -> vector<8x288xf32>
    %42 = arith.addf %37, %41 : vector<8x288xf32>
    %43 = vector.extract_strided_slice %1 {offsets = [0, 38], sizes = [4, 288], strides = [1, 1]} : vector<4x342xf32> to vector<4x288xf32>
    %c8 = arith.constant 8 : index
    %c0_27 = arith.constant 0 : index
    %c0_28 = arith.constant 0 : index
    %44 = vector.load %arg2[%c8, %c0_27, %c0_28] : memref<9x8x4xf32, #tpu.memory_space<vmem>>, vector<1x8x4xf32>
    %45 = vector.shape_cast %44 : vector<1x8x4xf32> to vector<8x4xf32>
    %cst_29 = arith.constant dense<0.000000e+00> : vector<8x288xf32>
    %46 = tpu.matmul %45, %43, %cst_29 {dimension_numbers = #tpu.dot_dimension_numbers<[1], [0], [0], [1], [0, 0, 1, 1], [], []>} : vector<8x4xf32>, vector<4x288xf32>, vector<8x288xf32> -> vector<8x288xf32>
    %47 = arith.addf %42, %46 : vector<8x288xf32>
    %c0_30 = arith.constant 0 : index
    %c0_31 = arith.constant 0 : index
    %48 = vector.load %arg3[%c0_30, %c0_31] : memref<8x1xf32, #tpu.memory_space<vmem>>, vector<8x1xf32>
    %49 = vector.broadcast %48 : vector<8x1xf32> to vector<8x288xf32>
    %50 = arith.addf %47, %49 : vector<8x288xf32>
    %cst_32 = arith.constant 0.000000e+00 : f32
    %51 = vector.broadcast %cst_32 : f32 to vector<8x288xf32>
    %52 = arith.maximumf %50, %51 : vector<8x288xf32>
    %c0_33 = arith.constant 0 : index
    %c0_34 = arith.constant 0 : index
    %c0_35 = arith.constant 0 : index
    %53 = vector.load %arg4[%c0_33, %c0_34, %c0_35] : memref<1x8x288xf32, #tpu.memory_space<vmem>>, vector<1x8x288xf32>
    %54 = vector.shape_cast %53 : vector<1x8x288xf32> to vector<8x288xf32>
    %55 = vector.shape_cast %52 : vector<8x288xf32> to vector<1x8x288xf32>
    tpu.vector_store %arg4[%c0_33, %c0_34, %c0_35], %55 {strides = array<i32>} : memref<1x8x288xf32, #tpu.memory_space<vmem>>, vector<1x8x288xf32>,
    return
  }
  func.func @transform_0(%arg0: i32) -> (i32, i32, i32) {
    %c0_i32 = arith.constant 0 : i32
    %c0_i32_0 = arith.constant 0 : i32
    %c0_i32_1 = arith.constant 0 : i32
    return %arg0, %c0_i32, %c0_i32_0 : i32, i32, i32
  }
  func.func @transform_1(%arg0: i32) -> (i32, i32, i32) {
    %c0_i32 = arith.constant 0 : i32
    %c0_i32_0 = arith.constant 0 : i32
    %c0_i32_1 = arith.constant 0 : i32
    %c0_i32_2 = arith.constant 0 : i32
    return %c0_i32, %c0_i32_0, %c0_i32_1 : i32, i32, i32
  }
  func.func @transform_2(%arg0: i32) -> (i32, i32) {
    %c0_i32 = arith.constant 0 : i32
    %c0_i32_0 = arith.constant 0 : i32
    %c0_i32_1 = arith.constant 0 : i32
    return %c0_i32, %c0_i32_0 : i32, i32
  }
  func.func @transform_3(%arg0: i32) -> (i32, i32, i32) {
    %c0_i32 = arith.constant 0 : i32
    %c0_i32_0 = arith.constant 0 : i32
    %c0_i32_1 = arith.constant 0 : i32
    return %arg0, %c0_i32, %c0_i32_0 : i32, i32, i32
  }
}

</mosaic_0001>

<bundles_post_ra>
// kernel: _basic_conv_forward.1
= control target key start
LH: loop header
LB: loop body
LE: loop exit
PB: predicated region body
PF: predicated region fallthrough
CT: control target
= control target key end

     0   :  { %s1912_s12 = smov 0   ;;  %s2054_s0 = inlined_call_operand.vmem [shape: f32[2,4,342], index: 0, kind: input, shape index: {}]   ;;  %s2055_s1 = inlined_call_operand.vmem [shape: f32[9,8,4], index: 1, kind: input, shape index: {}]   ;;  %s2056_s2 = inlined_call_operand.vmem [shape: f32[8,1], index: 2, kind: input, shape index: {}]   ;;  %s2057_s3 = inlined_call_operand.vmem [shape: f32[2,8,288], index: 3, kind: output, shape index: {}]  }
   0x1 LB: > { %s1709_s13 = sadd.s32 4294967295, %s1879_s12   ;;  %p1713_p0 = scmp.ge.s32.totalorder %s1879_s12, 1  ;;  %s1879_s12 = sphi %s1912_s12, %s13_s12  }
   0x2   : > { %p137_p1 = scmp.lt.s32.totalorder %s1879_s12, 3 }
   0x4   : > { %p138_p2 = pnand %p1713_p0, %p137_p1 }
   0x5   : > { %p161_p3 = scmp.lt.s32.totalorder (!%p138_p2), %s1709_s13, 1  ;;  %v1881_v0 = vmov (!%p138_p2), 0.0   ;;  %vm1882_vm0 = vmmov (!%p138_p2), 0   ;;  %s1883_s18 = smov (!%p138_p2), 127   ;;  %v1638_v4 = vld [vmem:[%s2056_s2] sm:$0xff] (!%p138_p2)  ;;  %v1891_v5 = vmov (!%p138_p2), 0  }
   0x6   : > { %141 = sbr.rel (%p138_p2) target bundleno = 424 (0x1a8), region = 32  ;;  %1789 = vmatprep.subr.mxu1 (!%p138_p2), %v1881_v0  ;;  %263 = vmatprep.mubr.f32.mxu0 (!%p138_p2), %v1881_v0  ;;  %s1884_s19 = smov (!%p138_p2), 126   ;;  %vm192_vm1 = vcmask (!%p138_p2), 1043456   ;;  %vm185_vm2 = vcmask (!%p138_p2), 1039360   ;;  %v1716_v11 = vld [vmem:[%s2055_s1 + $0x8] sm:$0xff] (!%p138_p2)  ;;  %vm188_vm3 = vcmask (!%p138_p2), 31744  }
   0x7   : > { %1791 = vmatprep.mubr.msk.f32.mxu1 (!%p138_p2), %vm1882_vm0, %v1881_v0  ;;  %s1885_s20 = smov (!%p138_p2), 110   ;;  %s1886_s21 = smov (!%p138_p2), 109   ;;  %1871 = vset.pattern.permute.xlu0 (!%p138_p2), %v1891_v5  ;;  %vm498_vm4 = vcmask (!%p138_p2), 1031168   ;;  %v173_v17 = vld [vmem:[%s2055_s1] sm:$0xff] (!%p138_p2)  ;;  %vm662_vm5 = vcmask (!%p138_p2), 900096   ;;  %v1727_v22 = vld [vmem:[%s2055_s1 + $0x10] sm:$0xff] (!%p138_p2) }
   0x8   : > { %s1887_s22 = smov (!%p138_p2), 108   ;;  %s1888_s23 = smov (!%p138_p2), 92   ;;  %v1733_v24 = vld [vmem:[%s2055_s1 + $0x18] sm:$0xff] (!%p138_p2)  ;;  %vm826_vm6 = vcmask (!%p138_p2), 891904   ;;  %v1739_v27 = vld [vmem:[%s2055_s1 + $0x20] sm:$0xff] (!%p138_p2)  ;;  %v1745_v32 = vld [vmem:[%s2055_s1 + $0x28] sm:$0xff] (!%p138_p2) }
   0x9   : > { %s1889_s24 = smov (!%p138_p2), 91   ;;  %s1890_s25 = smov (!%p138_p2), 90   ;;  %vm990_vm7 = vcmask (!%p138_p2), 883712   ;;  %v1751_v39 = vld [vmem:[%s2055_s1 + $0x30] sm:$0xff] (!%p138_p2)  ;;  %vm1154_vm8 = vcmask (!%p138_p2), 752640   ;;  %v1757_v42 = vld [vmem:[%s2055_s1 + $0x38] sm:$0xff] (!%p138_p2) }
   0xa   : > { %v1763_v46 = vld [vmem:[%s2055_s1 + $0x40] sm:$0xff] (!%p138_p2)  ;;  %vm1318_vm9 = vcmask (!%p138_p2), 744448   ;;  %vm1482_vm10 = vcmask (!%p138_p2), 736256   ;;  %vm1652_vm11 = vcmask (!%p138_p2), 261120  }
   0xd   : > { %s2059_s13 = smov (!%p161_p3, %s1709_s13), 1 }
   0xe   : > { %s1850_s14 = smul.u32 12, %s2059_s13 }
  0x10   : > { %s165_s17 = scalar_lea.vmem %s2054_s0, %s1850_s14 }
  0x11   : > { %v171_v1 = vld [vmem:[%s165_s17] sm:$0xff]  ;;  %v172_v3 = vld [vmem:[%s165_s17 + $0x8] sm:$0xf] }
  0x12   : > { %179 = vrot.lane.b32.xlu1 %v171_v1, %s1883_s18  ;;  %v178_v2 = vcombine.high %v171_v1, %v171_v1 }
  0x14   : > { %181 = vrot.lane.b32.xlu0 %v178_v2, %s1883_s18 }
  0x16   : > { %494 = vrot.lane.b32.xlu1 %v178_v2, %s1884_s19 }
  0x18   : > { %183 = vrot.lane.b32.xlu0 %v172_v3, %s1883_s18 }
  0x1a   : > { %492 = vrot.lane.b32.xlu1 %v171_v1, %s1884_s19 }
  0x1c   : > { %496 = vrot.lane.b32.xlu0 %v172_v3, %s1884_s19 }
  0x1e   : > { %660 = vrot.lane.b32.xlu1 %v172_v3, %s1885_s20 }
  0x20   : > { %658 = vrot.lane.b32.xlu0 %v178_v2, %s1885_s20 }
  0x22   : > { %822 = vrot.lane.b32.xlu1 %v178_v2, %s1886_s21 }
  0x24   : > { %656 = vrot.lane.b32.xlu0 %v171_v1, %s1885_s20 }
  0x26   : > { %820 = vrot.lane.b32.xlu1 %v171_v1, %s1886_s21 }
  0x28   : > { %824 = vrot.lane.b32.xlu0 %v172_v3, %s1886_s21  ;;  %s1851_s21 = smul.u32 24, %s2059_s13 }
  0x2a   : > { %988 = vrot.lane.b32.xlu1 %v172_v3, %s1887_s22 }
  0x2c   : > { %986 = vrot.lane.b32.xlu0 %v178_v2, %s1887_s22 }
  0x2e   : > { %1150 = vrot.lane.b32.xlu1 %v178_v2, %s1888_s23 }
  0x30   : > { %984 = vrot.lane.b32.xlu0 %v171_v1, %s1887_s22 }
  0x32   : > { %1148 = vrot.lane.b32.xlu1 %v171_v1, %s1888_s23 }
  0x34   : > { %1152 = vrot.lane.b32.xlu0 %v172_v3, %s1888_s23 }
  0x36   : > { %1316 = vrot.lane.b32.xlu1 %v172_v3, %s1889_s24 }
  0x38   : > { %1314 = vrot.lane.b32.xlu0 %v178_v2, %s1889_s24 }
  0x3a   : > { %1478 = vrot.lane.b32.xlu1 %v178_v2, %s1890_s25 }
  0x3c   : > { %1312 = vrot.lane.b32.xlu0 %v171_v1, %s1889_s24  ;;  %s170_s24 = scalar_lea.vmem %s2057_s3, %s1851_s21 }
  0x3e   : > { %1476 = vrot.lane.b32.xlu1 %v171_v1, %s1890_s25 }
  0x40   : > { %1480 = vrot.lane.b32.xlu0 %v172_v3, %s1890_s25 }
  0x44   : > { %1641 = vperm.xlu0 %1871, %v1638_v4  }
  0x84   : > { %v180_v6 = vpop.permute.xlu1 %179 }
  0x86   : > { %v182_v7 = vpop.permute.xlu0 %181 }
  0x87   : > { %v186_v12 = vsel %vm185_vm2, %v180_v6, %v182_v7 }
  0x88   : > { %v495_v8 = vpop.permute.xlu1 %494 }
  0x8a   : > { %v184_v9 = vpop.permute.xlu0 %183 }
  0x8b   : > { %1790 = vmatpush3.msk.msra.mxu1 %vm192_vm1, %v184_v9  ;;  %v187_v10 = vsel %vm185_vm2, %v182_v7, %v184_v9 }
  0x8c   : > { %1717 = vmatprep.subr.msk.mxu0 %vm192_vm1, %v187_v10  ;;  %v493_v13 = vpop.permute.xlu1 %492  ;;  %1792 = vmatmul.mubr.msk.f32.vlgmr.msra.gmra.mrb[0].mxu1 %vm188_vm3, %v1716_v11 }
  0x8d   : > { %1718 = vmatpush1.msk.msra.mxu0 %vm192_vm1, %v186_v12  ;;  %1794 = vmatprep.subr.mxu1 %v1881_v0  ;;  %v499_v19 = vsel %vm498_vm4, %v493_v13, %v495_v8 }
  0x8e   : > { %1719 = vmatmul.mubr.msk.f32.vlgmr.msra.gmra.mrb[0].mxu0 %vm188_vm3, %v1716_v11  ;;  %1722 = vmatprep.subr.msk.mxu0 %vm192_vm1, %v178_v2  ;;  %v497_v14 = vpop.permute.xlu0 %496 }
  0x8f   : > { %1723 = vmatpush1.msk.msra.mxu0 %vm192_vm1, %v171_v1  ;;  %v500_v15 = vsel %vm498_vm4, %v495_v8, %v497_v14  ;;  %1795 = vmatpush3.msk.msra.mxu1 %vm192_vm1, %v172_v3 }
  0x90   : > { %1728 = vmatprep.subr.msk.mxu0 %vm192_vm1, %v500_v15  ;;  %1796 = vmatprep.mubr.msk.f32.mxu1 %vm1882_vm0, %v1881_v0  ;;  %v661_v16 = vpop.permute.xlu1 %660 }
  0x91   : > { %1799 = vmatprep.subr.mxu1 %v1881_v0  ;;  %413 = vmatprep.mubr.f32.mxu0 %v1881_v0 }
  0x92   : > { %1797 = vmatmul.mubr.msk.f32.vlgmr.msra.gmra.mrb[2].mxu1 %vm188_vm3, %v173_v17  ;;  %v659_v18 = vpop.permute.xlu0 %658 }
  0x93   : > { %1800 = vmatpush3.msk.msra.mxu1 %vm192_vm1, %v497_v14  ;;  %1801 = vmatprep.mubr.msk.f32.mxu1 %vm1882_vm0, %v1881_v0  ;;  %v664_v21 = vsel %vm662_vm5, %v659_v18, %v661_v16 }
  0x94   : > { %1804 = vmatprep.subr.mxu1 %v1881_v0  ;;  %v823_v20 = vpop.permute.xlu1 %822 }
  0x96   : > { %1724 = vmatmul.mubr.msk.f32.vlgmr.msra.gmra.mrb[0].mxu0 %vm188_vm3, %v173_v17  ;;  %v657_v23 = vpop.permute.xlu0 %656  ;;  %1802 = vmatmul.mubr.msk.f32.vlgmr.msra.gmra.mrb[4].mxu1 %vm188_vm3, %v1727_v22 }
  0x97   : > { %1729 = vmatpush1.msk.msra.mxu0 %vm192_vm1, %v499_v19  ;;  %574 = vmatprep.mubr.f32.mxu0 %v1881_v0  ;;  %v663_v28 = vsel %vm662_vm5, %v657_v23, %v659_v18 }
  0x98   : > { %1734 = vmatprep.subr.msk.mxu0 %vm192_vm1, %v664_v21  ;;  %1805 = vmatpush3.msk.msra.mxu1 %vm192_vm1, %v661_v16  ;;  %v821_v25 = vpop.permute.xlu1 %820 }
  0x99   : > { %1806 = vmatprep.mubr.msk.f32.mxu1 %vm1882_vm0, %v1881_v0  ;;  %1809 = vmatprep.subr.mxu1 %v1881_v0  ;;  %v827_v35 = vsel %vm826_vm6, %v821_v25, %v823_v20 }
  0x9a   : > { %v825_v26 = vpop.permute.xlu0 %824  ;;  %1807 = vmatmul.mubr.msk.f32.vlgmr.msra.gmra.mrb[6].mxu1 %vm188_vm3, %v1733_v24 }
  0x9b   : > { %1810 = vmatpush3.msk.msra.mxu1 %vm192_vm1, %v825_v26  ;;  %1811 = vmatprep.mubr.msk.f32.mxu1 %vm1882_vm0, %v1881_v0  ;;  %v828_v30 = vsel %vm826_vm6, %v823_v20, %v825_v26 }
  0x9c   : > { %v989_v29 = vpop.permute.xlu1 %988  ;;  %1814 = vmatprep.subr.mxu1 %v1881_v0 }
  0x9e   : > { %1730 = vmatmul.mubr.msk.f32.vlgmr.msra.gmra.mrb[0].mxu0 %vm188_vm3, %v1727_v22  ;;  %v987_v31 = vpop.permute.xlu0 %986  ;;  %1812 = vmatmul.mubr.msk.f32.vlgmr.msra.gmra.mrb[8].mxu1 %vm188_vm3, %v1739_v27 }
  0x9f   : > { %1735 = vmatpush1.msk.msra.mxu0 %vm192_vm1, %v663_v28  ;;  %738 = vmatprep.mubr.f32.mxu0 %v1881_v0  ;;  %v992_v37 = vsel %vm990_vm7, %v987_v31, %v989_v29 }
  0xa0   : > { %1740 = vmatprep.subr.msk.mxu0 %vm192_vm1, %v828_v30  ;;  %v1151_v33 = vpop.permute.xlu1 %1150  ;;  %1815 = vmatpush3.msk.msra.mxu1 %vm192_vm1, %v989_v29 }
  0xa1   : > { %1816 = vmatprep.mubr.msk.f32.mxu1 %vm1882_vm0, %v1881_v0  ;;  %1819 = vmatprep.subr.mxu1 %v1881_v0 }
  0xa2   : > { %v985_v34 = vpop.permute.xlu0 %984  ;;  %1817 = vmatmul.mubr.msk.f32.vlgmr.msra.gmra.mrb[10].mxu1 %vm188_vm3, %v1745_v32 }
  0xa3   : > { %1821 = vmatprep.mubr.msk.f32.mxu1 %vm1882_vm0, %v1881_v0  ;;  %v991_v43 = vsel %vm990_vm7, %v985_v34, %v987_v31 }
  0xa4   : > { %v1149_v36 = vpop.permute.xlu1 %1148 }
  0xa5   : > { %v1155_v48 = vsel %vm1154_vm8, %v1149_v36, %v1151_v33 }
  0xa6   : > { %1736 = vmatmul.mubr.msk.f32.vlgmr.msra.gmra.mrb[0].mxu0 %vm188_vm3, %v1733_v24  ;;  %v1153_v38 = vpop.permute.xlu0 %1152 }
  0xa7   : > { %1741 = vmatpush1.msk.msra.mxu0 %vm192_vm1, %v827_v35  ;;  %902 = vmatprep.mubr.f32.mxu0 %v1881_v0  ;;  %v1156_v44 = vsel %vm1154_vm8, %v1151_v33, %v1153_v38 }
  0xa8   : > { %1746 = vmatprep.subr.msk.mxu0 %vm192_vm1, %v992_v37  ;;  %1820 = vmatpush3.msk.msra.mxu1 %vm192_vm1, %v1153_v38  ;;  %v1317_v40 = vpop.permute.xlu1 %1316 }
  0xa9   : > { %1822 = vmatmul.mubr.msk.f32.vlgmr.msra.gmra.mrb[12].mxu1 %vm188_vm3, %v1751_v39  ;;  %1824 = vmatprep.subr.mxu1 %v1881_v0 }
  0xaa   : > { %v1315_v41 = vpop.permute.xlu0 %1314  ;;  %1825 = vmatpush3.msk.msra.mxu1 %vm192_vm1, %v1317_v40  ;;  %1826 = vmatprep.mubr.msk.f32.mxu1 %vm1882_vm0, %v1881_v0 }
  0xab   : > { %1829 = vmatprep.subr.mxu1 %v1881_v0  ;;  %v1320_v49 = vsel %vm1318_vm9, %v1315_v41, %v1317_v40 }
  0xac   : > { %v1479_v50 = vpop.permute.xlu1 %1478 }
  0xad   : > { %1827 = vmatmul.mubr.msk.f32.vlgmr.msra.gmra.mrb[14].mxu1 %vm188_vm3, %v1757_v42 }
  0xae   : > { %1742 = vmatmul.mubr.msk.f32.vlgmr.msra.gmra.mrb[0].mxu0 %vm188_vm3, %v1739_v27  ;;  %v1313_v45 = vpop.permute.xlu0 %1312  ;;  %1831 = vmatprep.mubr.msk.f32.mxu1 %vm1882_vm0, %v1881_v0 }
  0xaf   : > { %1747 = vmatpush1.msk.msra.mxu0 %vm192_vm1, %v991_v43  ;;  %1066 = vmatprep.mubr.f32.mxu0 %v1881_v0  ;;  %v1319_v51 = vsel %vm1318_vm9, %v1313_v45, %v1315_v41 }
  0xb0   : > { %1752 = vmatprep.subr.msk.mxu0 %vm192_vm1, %v1156_v44  ;;  %v1477_v53 = vpop.permute.xlu1 %1476 }
  0xb1   : > { %v1483_v54 = vsel %vm1482_vm10, %v1477_v53, %v1479_v50 }
  0xb2   : > { %v1481_v47 = vpop.permute.xlu0 %1480 }
  0xb3   : > { %1830 = vmatpush3.msk.msra.mxu1 %vm192_vm1, %v1481_v47  ;;  %v1484_v52 = vsel %vm1482_vm10, %v1479_v50, %v1481_v47 }
  0xb4   : > { %1832 = vmatmul.mubr.msk.f32.vlgmr.msra.gmra.mrb[16].mxu1 %vm188_vm3, %v1763_v46 }
  0xb6   : > { %1748 = vmatmul.mubr.msk.f32.vlgmr.msra.gmra.mrb[0].mxu0 %vm188_vm3, %v1745_v32 }
  0xb7   : > { %1753 = vmatpush1.msk.msra.mxu0 %vm192_vm1, %v1155_v48  ;;  %1230 = vmatprep.mubr.f32.mxu0 %v1881_v0 }
  0xb8   : > { %1758 = vmatprep.subr.msk.mxu0 %vm192_vm1, %v1320_v49 }
  0xbe   : > { %1754 = vmatmul.mubr.msk.f32.vlgmr.msra.gmra.mrb[0].mxu0 %vm188_vm3, %v1751_v39 }
  0xbf   : > { %1759 = vmatpush1.msk.msra.mxu0 %vm192_vm1, %v1319_v51  ;;  %1394 = vmatprep.mubr.f32.mxu0 %v1881_v0 }
  0xc0   : > { %1764 = vmatprep.subr.msk.mxu0 %vm192_vm1, %v1484_v52 }
  0xc3   : > { %v1642_v15 = vpop.permute.xlu0 %1641 }
  0xc6   : > { %1760 = vmatmul.mubr.msk.f32.vlgmr.msra.gmra.mrb[0].mxu0 %vm188_vm3, %v1757_v42 }
  0xc7   : > { %1765 = vmatpush1.msk.msra.mxu0 %vm192_vm1, %v1483_v54  ;;  %1558 = vmatprep.mubr.f32.mxu0 %v1881_v0 }
  0xce   : > { %1766 = vmatmul.mubr.msk.f32.vlgmr.msra.gmra.mrb[0].mxu0 %vm188_vm3, %v1763_v46 }
 0x15f   : > { %v336_v55 = vpop.f32.mrb[0].mxu1 }
 0x160   : > { %v1793_v56 = vpop.f32.mrb[1].mxu1 }
 0x165   : > { %v486_v57 = vpop.f32.mrb[2].mxu1 }
 0x166   : > { %v487_v58 = vadd.f32 %v486_v57, %v336_v55  ;;  %v1798_v59 = vpop.f32.mrb[3].mxu1 }
 0x169   : > { %v647_v60 = vpop.f32.mrb[4].mxu1 }
 0x16a   : > { %v653_v61 = vadd.f32 %v647_v60, %v487_v58  ;;  %v1803_v62 = vpop.f32.mrb[5].mxu1 }
 0x16d   : > { %v811_v63 = vpop.f32.mrb[6].mxu1 }
 0x16e   : > { %v817_v1 = vadd.f32 %v811_v63, %v653_v61  ;;  %v1808_v2 = vpop.f32.mrb[7].mxu1 }
 0x171   : > { %v975_v3 = vpop.f32.mrb[8].mxu1 }
 0x172   : > { %v981_v4 = vadd.f32 %v975_v3, %v817_v1  ;;  %v1813_v5 = vpop.f32.mrb[9].mxu1 }
 0x175   : > { %v1139_v6 = vpop.f32.mrb[10].mxu1 }
 0x176   : > { %v1145_v7 = vadd.f32 %v1139_v6, %v981_v4  ;;  %v1818_v0 = vpop.f32.mrb[11].mxu1 }
 0x17c   : > { %v1303_v8 = vpop.f32.mrb[12].mxu1 }
 0x17d   : > { %v1309_v9 = vadd.f32 %v1303_v8, %v1145_v7  ;;  %v1823_v10 = vpop.f32.mrb[13].mxu1 }
 0x180   : > { %v1467_v11 = vpop.f32.mrb[14].mxu1 }
 0x181   : > { %v1473_v12 = vadd.f32 %v1467_v11, %v1309_v9  ;;  %v1828_v13 = vpop.f32.mrb[15].mxu1 }
 0x187   : > { %v1631_v14 = vpop.f32.mrb[16].mxu1 }
 0x188   : > { %v1637_v16 = vadd.f32 %v1631_v14, %v1473_v12  ;;  %v1833_v17 = vpop.f32.mrb[17].mxu1 }
 0x18a   : > { %v1646_v18 = vadd.f32 %v1642_v15, %v1637_v16 }
 0x18c   : > { %v1649_v19 = vmax.f32 %v1646_v18, 0.0 }
 0x18e   : > { %1653 = vst.msk [vmem:[%s170_s24 + $0x10] sm:$0xff] %vm1652_vm11, %v1649_v19 }
 0x1a1   : > { %v1560_v20 = vpop.f32.mrb[0].mxu0 }
 0x1a2   : > { %v1644_v21 = vadd.f32 %v1642_v15, %v1560_v20  ;;  %v1562_v22 = vpop.f32.mrb[1].mxu0 }
 0x1a3   : > { %v1645_v23 = vadd.f32 %v1642_v15, %v1562_v22 }
 0x1a4   : > { %v1647_v24 = vmax.f32 %v1644_v21, 0.0 }
 0x1a5   : > { %v1648_v25 = vmax.f32 %v1645_v23, 0.0 }
 0x1a6   : > { %1650 = vst [vmem:[%s170_s24] sm:$0xff] %v1647_v24 }
 0x1a7   : > { %1651 = vst [vmem:[%s170_s24 + $0x8] sm:$0xff] %v1648_v25 }
 0x1a8 PF: > { %s13_s12 = sadd.s32 1, %s1879_s12  }
 0x1a9   : > { %p10_p4 = scmp.ge.s32.totalorder %s13_s12, 4  }
 0x1ab   :  { %12 = sbr.rel (!%p10_p4) target bundleno = 1 (0x1), region = 70 }

</bundles_post_ra>
